<compile_context>
chip_gen: v7x
topology: tpu7x:2x2x1
jax: 0.10.0
libtpu: 0.0.40
codegen_flags: <defaults>
</compile_context>

<pallas_src>
import jax
import jax.numpy as jnp
from jax.experimental import pallas as pl
from jax.experimental.pallas import tpu as pltpu


def diabetes_mlp_kernel(x_ref, w1_ref, b1_ref, w2_ref, b2_ref, w3_ref, b3_ref,
                        out_ref):
    """Fused MLP on one batch tile; batch lands on the 128-lane axis.

    x_ref:  (TB, F) f32      w1_ref: (16, F) bf16   b1_ref: (16, 1) f32
                             w2_ref: (8, 16) bf16   b2_ref: (8, 1)  f32
                             w3_ref: (1, 8)  bf16   b3_ref: (1, 1)  f32
    out_ref: (1, TB) f32
    """
    xb = x_ref[...].astype(jnp.bfloat16)                      # (TB, F)

    # Layer 1: contract F of both operands (w1 @ x^T) -> (16, TB).
    # This is the standard "NT" matmul pattern; the feature-major relayout of
    # the x tile happens inside the MXU lowering (in-VMEM, no HBM traffic).
    h1 = jax.lax.dot_general(
        w1_ref[...], xb,
        dimension_numbers=(((1,), (1,)), ((), ())),
        preferred_element_type=jnp.float32)                   # (16, TB) f32
    h1 = jnp.maximum(h1 + b1_ref[...], 0.0)

    # Layer 2: (8, 16) @ (16, TB) -> (8, TB), bias, ReLU.
    h2 = jnp.dot(w2_ref[...], h1.astype(jnp.bfloat16),
                 preferred_element_type=jnp.float32)
    h2 = jnp.maximum(h2 + b2_ref[...], 0.0)

    # Layer 3: (1, 8) @ (8, TB) -> (1, TB), bias, sigmoid (exp on EUP slot).
    h3 = jnp.dot(w3_ref[...], h2.astype(jnp.bfloat16),
                 preferred_element_type=jnp.float32)
    out_ref[...] = jax.nn.sigmoid(h3 + b3_ref[...]).astype(out_ref.dtype)


def diabetes_model_forward(x, params, *, tile_b=32768):
    """Forward pass matching DiabetesModel.forward.

    x: (B, input_size) float32, row-major batch (PyTorch convention); used
       in place — no transpose or pad copies in the wrapper.
    params (PyTorch-native orientation, float32):
        w1 (16, F), b1 (16, 1), w2 (8, 16), b2 (8, 1), w3 (1, 8), b3 (1, 1).
    Returns: (B, 1) float32 probabilities.
    """
    B, F = x.shape

    # Weights cast to bf16 once per call (tiny); biases stay f32.
    w1 = params["w1"].astype(jnp.bfloat16)
    w2 = params["w2"].astype(jnp.bfloat16)
    w3 = params["w3"].astype(jnp.bfloat16)
    b1 = params["b1"].astype(jnp.float32)
    b2 = params["b2"].astype(jnp.float32)
    b3 = params["b3"].astype(jnp.float32)

    # Batch tile: multiple of 128 lanes, capped so the grid has >= 2 steps
    # whenever B > 128 (lets v7x shard the parallel batch axis over both TCs).
    b_lanes = pl.cdiv(B, 128) * 128
    two_step_tb = pl.cdiv(b_lanes, 2 * 128) * 128 if b_lanes >= 256 else b_lanes
    tb = min(int(tile_b), int(b_lanes), int(two_step_tb))
    tb = max(128, (tb // 128) * 128)

    grid = (pl.cdiv(B, tb),)  # ragged last block handled by Pallas masking

    def const_spec(a):
        # Same block every grid step -> stays VMEM-resident (no re-DMA).
        return pl.BlockSpec(a.shape, lambda i: (0,) * a.ndim)

    out_fm = pl.pallas_call(
        diabetes_mlp_kernel,
        out_shape=jax.ShapeDtypeStruct((1, B), jnp.float32),
        grid=grid,
        in_specs=[pl.BlockSpec((tb, F), lambda i: (i, 0)),   # x tile (TB, F)
                  const_spec(w1), const_spec(b1),
                  const_spec(w2), const_spec(b2),
                  const_spec(w3), const_spec(b3)],
        out_specs=pl.BlockSpec((1, tb), lambda i: (0, i)),   # lane-dense out
        compiler_params=pltpu.CompilerParams(
            dimension_semantics=("parallel",)),
    )(x, w1, b1, w2, b2, w3, b3)

    # (1, B) -> (B, 1): same contiguous buffer, free reshape.
    return out_fm.reshape(B, 1)


def init_params(key, input_size):
    """nn.Linear-style init; weights kept in PyTorch (out, in) orientation.

    Biases are stored as (out, 1) columns so they broadcast along the lane
    (batch) axis inside the kernel.
    """
    k1, k2, k3, k4, k5, k6 = jax.random.split(key, 6)

    def uniform_init(k, shape, fan_in):
        bound = 1.0 / jnp.sqrt(jnp.float32(fan_in))
        return jax.random.uniform(k, shape, jnp.float32, -bound, bound)

    return {
        "w1": uniform_init(k1, (16, input_size), input_size),
        "b1": uniform_init(k2, (16, 1), input_size),
        "w2": uniform_init(k3, (8, 16), 16),
        "b2": uniform_init(k4, (8, 1), 16),
        "w3": uniform_init(k5, (1, 8), 8),
        "b3": uniform_init(k6, (1, 1), 8),
    }


if __name__ == "__main__":
    key = jax.random.PRNGKey(0)
    k_x, k_p = jax.random.split(key)

    batch = 300          # not a multiple of 128: exercises the ragged last block
    input_size = 8       # Pima diabetes dataset has 8 features

    x = jax.random.normal(k_x, (batch, input_size), dtype=jnp.float32)
    params = init_params(k_p, input_size)

    # Default tile -> 2-step parallel grid with a masked ragged last block.
    out = jax.block_until_ready(diabetes_model_forward(x, params))
    # Small tile -> 3-step pipelined grid (exercises multi-step path too).
    out_small = jax.block_until_ready(
        diabetes_model_forward(x, params, tile_b=128))

    # Plain-JAX f32 reference in the PyTorch orientation: x @ W.T + b.
    h1 = jnp.maximum(x @ params["w1"].T + params["b1"].T, 0.0)
    h2 = jnp.maximum(h1 @ params["w2"].T + params["b2"].T, 0.0)
    ref = jax.nn.sigmoid(h2 @ params["w3"].T + params["b3"].T)

    assert out.shape == (batch, 1)
    # bf16 matmul operands (f32 accumulation) vs f32 reference: loosened atol.
    assert jnp.allclose(out, ref, atol=3e-2), "mismatch vs reference (default tile)"
    assert jnp.allclose(out_small, ref, atol=3e-2), "mismatch vs reference (small tile)"

    print("KERNEL_OK")
</pallas_src>

<mosaic_0001>
module attributes {stable_mosaic.version = 11 : i64} {
  func.func @diabetes_mlp_kernel(%arg0: i32, %arg1: memref<256x8xf32, #tpu.memory_space<vmem>>, %arg2: memref<16x8xbf16, #tpu.memory_space<vmem>>, %arg3: memref<16x1xf32, #tpu.memory_space<vmem>>, %arg4: memref<8x16xbf16, #tpu.memory_space<vmem>>, %arg5: memref<8x1xf32, #tpu.memory_space<vmem>>, %arg6: memref<1x8xbf16, #tpu.memory_space<vmem>>, %arg7: memref<1x1xf32, #tpu.memory_space<vmem>>, %arg8: memref<1x256xf32, #tpu.memory_space<vmem>>) attributes {dimension_semantics = [#tpu.dimension_semantics<parallel>], iteration_bounds = array<i64: 2>, scalar_prefetch = 0 : i64, scratch_operands = 0 : i64, tpu.core_type = #tpu.core_type<tc>, window_params = [{transform_indices = @transform_0, window_bounds = array<i64: 256, 8>}, {pipeline_mode = #tpu.pipeline_mode<synchronous>, transform_indices = @transform_1, window_bounds = array<i64: 16, 8>}, {pipeline_mode = #tpu.pipeline_mode<synchronous>, transform_indices = @transform_2, window_bounds = array<i64: 16, 1>}, {pipeline_mode = #tpu.pipeline_mode<synchronous>, transform_indices = @transform_3, window_bounds = array<i64: 8, 16>}, {pipeline_mode = #tpu.pipeline_mode<synchronous>, transform_indices = @transform_4, window_bounds = array<i64: 8, 1>}, {pipeline_mode = #tpu.pipeline_mode<synchronous>, transform_indices = @transform_5, window_bounds = array<i64: 1, 8>}, {pipeline_mode = #tpu.pipeline_mode<synchronous>, transform_indices = @transform_6, window_bounds = array<i64: 1, 1>}, {transform_indices = @transform_7, window_bounds = array<i64: 1, 256>}]} {
    %c0 = arith.constant 0 : index
    %c0_0 = arith.constant 0 : index
    %0 = vector.load %arg1[%c0, %c0_0] : memref<256x8xf32, #tpu.memory_space<vmem>>, vector<256x8xf32>
    %1 = arith.truncf %0 : vector<256x8xf32> to vector<256x8xbf16>
    %c0_1 = arith.constant 0 : index
    %c0_2 = arith.constant 0 : index
    %2 = vector.load %arg2[%c0_1, %c0_2] : memref<16x8xbf16, #tpu.memory_space<vmem>>, vector<16x8xbf16>
    %cst = arith.constant dense<0.000000e+00> : vector<16x256xf32>
    %3 = tpu.matmul %2, %1, %cst {dimension_numbers = #tpu.dot_dimension_numbers<[1], [1], [0], [0], [0, 0, 1, 0], [], []>} : vector<16x8xbf16>, vector<256x8xbf16>, vector<16x256xf32> -> vector<16x256xf32>
    %c0_3 = arith.constant 0 : index
    %c0_4 = arith.constant 0 : index
    %4 = vector.load %arg3[%c0_3, %c0_4] : memref<16x1xf32, #tpu.memory_space<vmem>>, vector<16x1xf32>
    %5 = vector.broadcast %4 : vector<16x1xf32> to vector<16x256xf32>
    %6 = arith.addf %3, %5 : vector<16x256xf32>
    %cst_5 = arith.constant 0.000000e+00 : f32
    %7 = vector.broadcast %cst_5 : f32 to vector<16x256xf32>
    %8 = arith.maximumf %6, %7 : vector<16x256xf32>
    %c0_6 = arith.constant 0 : index
    %c0_7 = arith.constant 0 : index
    %9 = vector.load %arg4[%c0_6, %c0_7] : memref<8x16xbf16, #tpu.memory_space<vmem>>, vector<8x16xbf16>
    %10 = arith.truncf %8 : vector<16x256xf32> to vector<16x256xbf16>
    %cst_8 = arith.constant dense<0.000000e+00> : vector<8x256xf32>
    %11 = tpu.matmul %9, %10, %cst_8 {dimension_numbers = #tpu.dot_dimension_numbers<[1], [0], [0], [1], [0, 0, 1, 1], [], []>} : vector<8x16xbf16>, vector<16x256xbf16>, vector<8x256xf32> -> vector<8x256xf32>
    %c0_9 = arith.constant 0 : index
    %c0_10 = arith.constant 0 : index
    %12 = vector.load %arg5[%c0_9, %c0_10] : memref<8x1xf32, #tpu.memory_space<vmem>>, vector<8x1xf32>
    %13 = vector.broadcast %12 : vector<8x1xf32> to vector<8x256xf32>
    %14 = arith.addf %11, %13 : vector<8x256xf32>
    %cst_11 = arith.constant 0.000000e+00 : f32
    %15 = vector.broadcast %cst_11 : f32 to vector<8x256xf32>
    %16 = arith.maximumf %14, %15 : vector<8x256xf32>
    %c0_12 = arith.constant 0 : index
    %c0_13 = arith.constant 0 : index
    %17 = vector.load %arg6[%c0_12, %c0_13] : memref<1x8xbf16, #tpu.memory_space<vmem>>, vector<1x8xbf16>
    %18 = arith.truncf %16 : vector<8x256xf32> to vector<8x256xbf16>
    %cst_14 = arith.constant dense<0.000000e+00> : vector<1x256xf32>
    %19 = tpu.matmul %17, %18, %cst_14 {dimension_numbers = #tpu.dot_dimension_numbers<[1], [0], [0], [1], [0, 0, 1, 1], [], []>} : vector<1x8xbf16>, vector<8x256xbf16>, vector<1x256xf32> -> vector<1x256xf32>
    %c0_15 = arith.constant 0 : index
    %c0_16 = arith.constant 0 : index
    %20 = vector.load %arg7[%c0_15, %c0_16] : memref<1x1xf32, #tpu.memory_space<vmem>>, vector<1x1xf32>
    %21 = vector.broadcast %20 : vector<1x1xf32> to vector<1x256xf32>
    %22 = arith.addf %19, %21 : vector<1x256xf32>
    %23 = arith.negf %22 : vector<1x256xf32>
    %24 = math.exp %23 : vector<1x256xf32>
    %cst_17 = arith.constant 1.000000e+00 : f32
    %25 = vector.broadcast %cst_17 : f32 to vector<1x256xf32>
    %26 = arith.addf %25, %24 : vector<1x256xf32>
    %27 = arith.divf %25, %26 : vector<1x256xf32>
    %c0_18 = arith.constant 0 : index
    %c0_19 = arith.constant 0 : index
    %28 = vector.load %arg8[%c0_18, %c0_19] : memref<1x256xf32, #tpu.memory_space<vmem>>, vector<1x256xf32>
    tpu.vector_store %arg8[%c0_18, %c0_19], %27 {strides = array<i32>} : memref<1x256xf32, #tpu.memory_space<vmem>>, vector<1x256xf32>,
    return
  }
  func.func @transform_0(%arg0: i32) -> (i32, i32) {
    %c0_i32 = arith.constant 0 : i32
    %c0_i32_0 = arith.constant 0 : i32
    return %arg0, %c0_i32 : i32, i32
  }
  func.func @transform_1(%arg0: i32) -> (i32, i32) {
    %c0_i32 = arith.constant 0 : i32
    %c0_i32_0 = arith.constant 0 : i32
    %c0_i32_1 = arith.constant 0 : i32
    return %c0_i32, %c0_i32_0 : i32, i32
  }
  func.func @transform_2(%arg0: i32) -> (i32, i32) {
    %c0_i32 = arith.constant 0 : i32
    %c0_i32_0 = arith.constant 0 : i32
    %c0_i32_1 = arith.constant 0 : i32
    return %c0_i32, %c0_i32_0 : i32, i32
  }
  func.func @transform_3(%arg0: i32) -> (i32, i32) {
    %c0_i32 = arith.constant 0 : i32
    %c0_i32_0 = arith.constant 0 : i32
    %c0_i32_1 = arith.constant 0 : i32
    return %c0_i32, %c0_i32_0 : i32, i32
  }
  func.func @transform_4(%arg0: i32) -> (i32, i32) {
    %c0_i32 = arith.constant 0 : i32
    %c0_i32_0 = arith.constant 0 : i32
    %c0_i32_1 = arith.constant 0 : i32
    return %c0_i32, %c0_i32_0 : i32, i32
  }
  func.func @transform_5(%arg0: i32) -> (i32, i32) {
    %c0_i32 = arith.constant 0 : i32
    %c0_i32_0 = arith.constant 0 : i32
    %c0_i32_1 = arith.constant 0 : i32
    return %c0_i32, %c0_i32_0 : i32, i32
  }
  func.func @transform_6(%arg0: i32) -> (i32, i32) {
    %c0_i32 = arith.constant 0 : i32
    %c0_i32_0 = arith.constant 0 : i32
    %c0_i32_1 = arith.constant 0 : i32
    return %c0_i32, %c0_i32_0 : i32, i32
  }
  func.func @transform_7(%arg0: i32) -> (i32, i32) {
    %c0_i32 = arith.constant 0 : i32
    %c0_i32_0 = arith.constant 0 : i32
    return %c0_i32, %arg0 : i32, i32
  }
}

</mosaic_0001>

<bundles_post_ra>
// kernel: tpu_custom_call.1
= control target key start
LH: loop header
LB: loop body
LE: loop exit
PB: predicated region body
PF: predicated region fallthrough
CT: control target
= control target key end

     0   :  { %s1110_s0 = inlined_call_operand.vmem [shape: f32[300,8], index: 0, kind: input, shape index: {}]   ;;  %s1111_s1 = inlined_call_operand.vmem [shape: bf16[16,8], index: 1, kind: input, shape index: {}]   ;;  %s1112_s2 = inlined_call_operand.vmem [shape: f32[16,1], index: 2, kind: input, shape index: {}]   ;;  %s1113_s3 = inlined_call_operand.vmem [shape: bf16[8,16], index: 3, kind: input, shape index: {}]   ;;  %s1114_s4 = inlined_call_operand.vmem [shape: f32[8,1], index: 4, kind: input, shape index: {}]   ;;  %s1115_s5 = inlined_call_operand.vmem [shape: bf16[1,8], index: 5, kind: input, shape index: {}]   ;;  %s1116_s6 = inlined_call_operand.<no memory space> [shape: f32[1,1], index: 6, kind: input, shape index: {}]   ;;  %s1117_s7 = inlined_call_operand.hbm [shape: f32[1,300], index: 7, kind: output, shape index: {}]  }
   0x1   :  { %v12_v0 = vstv %s1116_s6 }
   0x2   :  { %13 = vst [vmem:[#allocation2] sm:$0x1] %v12_v0 }
   0x3   :  { %14 = vsyncpa [#allocation4], 0 }
   0x4   :  { %16 = vsyncpa [#allocation4 + $0x1], 0  ;;  %s916_s26 = smov 0   ;;  %s918_s27 = smov 0  }
   0x5   :  { %s920_s28 = smov 0   ;;  %s922_s29 = smov 0  }
   0x6 LB: > { %s937_s6 = sadd.s32 4294967295, %s868_s29   ;;  %s707_s30 = sadd.s32 4294967294, %s868_s29   ;;  %s868_s29 = sphi %s922_s29, %s1123_s29   ;;  %s864_s28 = sphi %s920_s28, %s1122_s28   ;;  %s860_s27 = sphi %s918_s27, %s1121_s27   ;;  %s856_s26 = sphi %s916_s26, %s1120_s26  }
   0x7   : > { %s941_s8 = sadd.s32 1, %s868_s29   ;;  %s181_s9 = sadd.s32 1, %s864_s28 }
   0x8   : > { %s178_s10 = ssub.s32 %s868_s29, %s941_s8  ;;  %p191_p0 = scmp.ne.s32.totalorder %s864_s28, %s860_s27 }
   0x9   : > { %p179_p1 = scmp.eq.s32.totalorder %s178_s10, 0  ;;  %p192_p2 = scmp.eq.s32.totalorder %s937_s6, 1 }
   0xa   : > { %p197_p3 = scmp.ne.s32.totalorder %s860_s27, %s856_s26  ;;  %p198_p4 = scmp.eq.s32.totalorder %s707_s30, 1 }
   0xb   : > { %s952_s11 = scalar_select %p179_p1, %s864_s28, %s181_s9  }
   0xc   : > { %p954_p5 = por %p192_p2, %p191_p0  ;;  %p958_p6 = por %p198_p4, %p197_p3 }
   0xd   : > { %p710_p7 = scmp.ge.s32.totalorder %s868_s29, 1  ;;  %p251_p8 = scmp.lt.s32.totalorder %s868_s29, 3 }
   0xf   : > { %p252_p9 = pnand %p710_p7, %p251_p8 }
  0x10   : > { %s965_s14 = sshll.u32 (!%p252_p9), %s937_s6, 5  ;;  %v971_v1 = vld [vmem:[%s1111_s1] sm:$0xff] (!%p252_p9)   ;;  %vm374_vm0 = vcmask (!%p252_p9), 64512   ;;  %v870_v3 = vmov (!%p252_p9), 0   ;;  %v358_v4 = vld [vmem:[%s1112_s2 + $0x8] sm:$0xff] (!%p252_p9)  ;;  %vm482_vm1 = vcmask (!%p252_p9), 130048  }
  0x11   : > { %255 = sbr.rel (%p252_p9) target bundleno = 819 (0x333), region = 48  ;;  %p292_p10 = scmp.lt.s32.totalorder (!%p252_p9), %s965_s14, 37  ;;  %v357_v2 = vld [vmem:[%s1112_s2] sm:$0xff] (!%p252_p9)  ;;  %795 = vset.pattern.permute.xlu0 (!%p252_p9), %v870_v3  ;;  %518 = vmatprep.mubr.bf16.mxu1 (!%p252_p9), %v870_v3  ;;  %vm545_vm2 = vcmask (!%p252_p9), 1043456  }
  0x12   : > { %745 = vmatprep.mubr.msk.bf16.mxu0 (!%p252_p9), %vm374_vm0, %v971_v1  ;;  %361 = vperm.xlu0 (!%p252_p9), %795, %v357_v2   ;;  %v476_v61 = vld [vmem:[%s1114_s4] sm:$0xff] (!%p252_p9)  ;;  %s284_s18 = sand.u32 (!%p252_p9), 1, %s860_s27  }
  0x13   : > { %796 = vset.pattern.permute.xlu1 (!%p252_p9), %v870_v3  ;;  %v532_v62 = vld [vmem:[#allocation2] sm:$0x1] (!%p252_p9)  ;;  %s1056_s21 = scalar_lea.sflag (!%p252_p9), [#allocation4], %s284_s18 }
  0x14   : > { %479 = vperm.xlu1 (!%p252_p9), %796, %v476_v61  }
  0x16   : > { %366 = vperm.xlu0 (!%p252_p9), %795, %v358_v4  }
  0x18   : > { %s293_s19 = scalar_select %p292_p10, %s965_s14, 37  ;;  %535 = vperm.xlu1 %796, %v532_v62  }
  0x1a   : > { %s713_s22 = sshll.u32 %s293_s19, 3  ;;  %s711_s19 = sshll.u32 %s284_s18, 1 }
  0x1b   : > { %s988_s25 = scalar_lea.vmem %s1110_s0, %s713_s22  ;;  %s286_s20 = scalar_lea.vmem [#allocation3], %s711_s19 }
  0x1c   : > { %v323_v5 = vld [vmem:[%s988_s25 + $0x80] sm:$0xff]  ;;  %v324_v6 = vld [vmem:[%s988_s25 + $0x88] sm:$0xff]  ;;  %v325_v10 = vld [vmem:[%s988_s25 + $0x90] sm:$0xff]  ;;  %s722_s22 = sshll.u32 (%p954_p5), %s937_s6, 1 }
  0x1d   : > { %v307_v7 = vld [vmem:[%s988_s25] sm:$0xff]  ;;  %v347_v8 = vpack.c.bf16 %v324_v6, %v323_v5  ;;  %v308_v9 = vld [vmem:[%s988_s25 + $0x8] sm:$0xff]  ;;  %v326_v11 = vld [vmem:[%s988_s25 + $0x98] sm:$0xff]  ;;  %s637_s23 = ssub.s32 (%p954_p5), 3, %s722_s22 }
  0x1e   : > { %v339_v12 = vpack.c.bf16 %v308_v9, %v307_v7  ;;  %v348_v13 = vpack.c.bf16 %v326_v11, %v325_v10  ;;  %v309_v14 = vld [vmem:[%s988_s25 + $0x10] sm:$0xff]  ;;  %v310_v15 = vld [vmem:[%s988_s25 + $0x18] sm:$0xff]  ;;  %v327_v18 = vld [vmem:[%s988_s25 + $0xa0] sm:$0xff]  ;;  %p638_p11 = scmp.lt.s32.totalorder (%p954_p5), %s637_s23, 2 }
  0x1f   : > { %747 = vmatprep.subr.msk.bf16.mxu0 %vm374_vm0, %v347_v8  ;;  %v340_v17 = vpack.c.bf16 %v310_v15, %v309_v14  ;;  %v328_v19 = vld [vmem:[%s988_s25 + $0xa8] sm:$0xff]  ;;  %v311_v22 = vld [vmem:[%s988_s25 + $0x20] sm:$0xff]  ;;  %v329_v25 = vld [vmem:[%s988_s25 + $0xb0] sm:$0xff] }
  0x20   : > { %v379_v16 = vsel %vm374_vm0, %v339_v12, 0  ;;  %v349_v21 = vpack.c.bf16 %v328_v19, %v327_v18  ;;  %v312_v23 = vld [vmem:[%s988_s25 + $0x28] sm:$0xff]  ;;  %v330_v26 = vld [vmem:[%s988_s25 + $0xb8] sm:$0xff]  ;;  %v313_v29 = vld [vmem:[%s988_s25 + $0x30] sm:$0xff] }
  0x21   : > { %730 = vmatpush3.bf16.xpose.msra.mxu0 %v379_v16  ;;  %v382_v20 = vsel %vm374_vm0, %v340_v17, 0  ;;  %v341_v24 = vpack.c.bf16 %v312_v23, %v311_v22  ;;  %v350_v28 = vpack.c.bf16 %v330_v26, %v329_v25  ;;  %v314_v30 = vld [vmem:[%s988_s25 + $0x38] sm:$0xff]  ;;  %v331_v32 = vld [vmem:[%s988_s25 + $0xc0] sm:$0xff]  ;;  %v332_v33 = vld [vmem:[%s988_s25 + $0xc8] sm:$0xff] }
  0x22   : > { %748 = vmatprep.subr.msk.bf16.mxu0 %vm374_vm0, %v348_v13  ;;  %v342_v31 = vpack.c.bf16 %v314_v30, %v313_v29  ;;  %v351_v35 = vpack.c.bf16 %v332_v33, %v331_v32  ;;  %v315_v36 = vld [vmem:[%s988_s25 + $0x40] sm:$0xff]  ;;  %v316_v37 = vld [vmem:[%s988_s25 + $0x48] sm:$0xff]  ;;  %v333_v39 = vld [vmem:[%s988_s25 + $0xd0] sm:$0xff]  ;;  %v538_v29 = vlaneseq }
  0x23   : > { %v385_v27 = vsel %vm374_vm0, %v341_v24, 0  ;;  %v343_v38 = vpack.c.bf16 %v316_v37, %v315_v36  ;;  %v334_v40 = vld [vmem:[%s988_s25 + $0xd8] sm:$0xff]  ;;  %v317_v43 = vld [vmem:[%s988_s25 + $0x50] sm:$0xff]  ;;  %v335_v46 = vld [vmem:[%s988_s25 + $0xe0] sm:$0xff] }
  0x24   : > { %v388_v34 = vsel %vm374_vm0, %v342_v31, 0  ;;  %v352_v42 = vpack.c.bf16 %v334_v40, %v333_v39  ;;  %v318_v44 = vld [vmem:[%s988_s25 + $0x58] sm:$0xff]  ;;  %v336_v47 = vld [vmem:[%s988_s25 + $0xe8] sm:$0xff]  ;;  %v319_v50 = vld [vmem:[%s988_s25 + $0x60] sm:$0xff]  ;;  %v539_v30 = vshrl.u32 %v538_v29, 7  ;;  %vm625_vm3 = vcmp.lt.s32.totalorder %v538_v29, 256 }
  0x25   : > { %v391_v41 = vsel %vm374_vm0, %v343_v38, 0  ;;  %v344_v45 = vpack.c.bf16 %v318_v44, %v317_v43  ;;  %v353_v49 = vpack.c.bf16 %v336_v47, %v335_v46  ;;  %v320_v51 = vld [vmem:[%s988_s25 + $0x68] sm:$0xff]  ;;  %v337_v53 = vld [vmem:[%s988_s25 + $0xf0] sm:$0xff]  ;;  %v338_v54 = vld [vmem:[%s988_s25 + $0xf8] sm:$0xff]  ;;  %v871_v46 = vmov 1966171168  }
  0x26   : > { %v345_v52 = vpack.c.bf16 %v320_v51, %v319_v50  ;;  %v354_v56 = vpack.c.bf16 %v338_v54, %v337_v53  ;;  %v321_v57 = vld [vmem:[%s988_s25 + $0x70] sm:$0xff]  ;;  %v322_v58 = vld [vmem:[%s988_s25 + $0x78] sm:$0xff]  ;;  %v473_v16 = vld [vmem:[%s1113_s3] sm:$0xf]  ;;  %v540_v31 = vsub.s32 0, %v539_v30  ;;  %v609_v47 = vunpack.c.l.s4 %v871_v46 }
  0x27   : > { %v394_v48 = vsel %vm374_vm0, %v344_v45, 0  ;;  %v346_v59 = vpack.c.bf16 %v322_v58, %v321_v57 }
  0x28   : > { %v397_v55 = vsel %vm374_vm0, %v345_v52, 0 }
  0x29   : > { %732 = vmatpush3.bf16.xpose.msra.mxu0 %v382_v20  ;;  %v400_v60 = vsel %vm374_vm0, %v346_v59, 0 }
  0x2a   : > { %749 = vmatprep.subr.msk.bf16.mxu0 %vm374_vm0, %v349_v21 }
  0x31   : > { %734 = vmatpush3.bf16.xpose.msra.mxu0 %v385_v27 }
  0x32   : > { %750 = vmatprep.subr.msk.bf16.mxu0 %vm374_vm0, %v350_v28 }
  0x39   : > { %736 = vmatpush3.bf16.xpose.msra.mxu0 %v388_v34 }
  0x3a   : > { %751 = vmatprep.subr.msk.bf16.mxu0 %vm374_vm0, %v351_v35 }
  0x41   : > { %738 = vmatpush3.bf16.xpose.msra.mxu0 %v391_v41 }
  0x42   : > { %752 = vmatprep.subr.msk.bf16.mxu0 %vm374_vm0, %v352_v42 }
  0x49   : > { %740 = vmatpush3.bf16.xpose.msra.mxu0 %v394_v48  ;;  %v610_v48 = vunpack.c.0.s8 %v609_v47 }
  0x4a   : > { %753 = vmatprep.subr.msk.bf16.mxu0 %vm374_vm0, %v353_v49 }
  0x4b   : > { %v613_v50 = vsub.s32 %v610_v48, %v539_v30 }
  0x51   : > { %742 = vmatpush3.bf16.xpose.msra.mxu0 %v397_v55 }
  0x52   : > { %754 = vmatprep.subr.msk.bf16.mxu0 %vm374_vm0, %v354_v56 }
  0x59   : > { %744 = vmatpush3.bf16.xpose.msra.mxu0 %v400_v60 }
  0x60   : > { %746 = vmatmul.mubr.msk.bf16.vlgmr.msra.gmra.mrb[0].mxu0 %vm374_vm0, %v971_v1 }
  0x91   : > { %v362_v63 = vpop.permute.xlu0 %361 }
  0x93   : > { %v480_v17 = vpop.permute.xlu1 %479 }
  0x95   : > { %v367_v5 = vpop.permute.xlu0 %366 }
  0x97   : > { %v536_v32 = vpop.permute.xlu1 %535 }
  0x98   : > { %v541_v33 = vrot.slane %v536_v32, %v540_v31 }
 0x133   : > { %v460_v0 = vpop.f32.mrb[0].mxu0 }
 0x134   : > { %v461_v2 = vadd.f32 %v460_v0, %v362_v63  ;;  %v462_v4 = vpop.f32.mrb[1].mxu0 }
 0x135   : > { %v463_v6 = vadd.f32 %v462_v4, %v362_v63  ;;  %v464_v7 = vpop.f32.mrb[2].mxu0 }
 0x136   : > { %v465_v8 = vadd.f32 %v464_v7, %v367_v5  ;;  %v466_v9 = vpop.f32.mrb[3].mxu0  ;;  %v469_v11 = vmax.f32 %v461_v2, 0.0 }
 0x137   : > { %v467_v10 = vadd.f32 %v466_v9, %v367_v5  ;;  %v470_v1 = vmax.f32 %v463_v6, 0.0 }
 0x138   : > { %v471_v12 = vmax.f32 %v465_v8, 0.0 }
 0x139   : > { %v472_v13 = vmax.f32 %v467_v10, 0.0 }
 0x13a   : > { %v474_v14 = vpack.c.bf16 %v471_v12, %v469_v11 }
 0x13b   : > { %v475_v15 = vpack.c.bf16 %v472_v13, %v470_v1 }
 0x13d   : > { %486 = vmatprep.subr.bf16.mxu1 %v475_v15 }
 0x13e   : > { %487 = vmatpush1.bf16.msra.mxu1 %v474_v14 }
 0x141   : > { %716 = vmatmul.mubr.msk.bf16.vlgmr.msra.gmra.mrb[0].mxu1 %vm482_vm1, %v473_v16 }
 0x142   : > { %584 = vmatprep.mubr.bf16.mxu1 %v870_v3  ;;  %v529_v3 = vld [vmem:[%s1115_s5] sm:$0x1] }
 0x214   : > { %v520_v18 = vpop.f32.mrb[0].mxu1 }
 0x215   : > { %v521_v19 = vadd.f32 %v520_v18, %v480_v17  ;;  %v522_v20 = vpop.f32.mrb[1].mxu1 }
 0x216   : > { %v523_v21 = vadd.f32 %v522_v20, %v480_v17  ;;  %v524_v22 = vpop.f32.mrb[2].mxu1 }
 0x217   : > { %v527_v23 = vmax.f32 %v521_v19, 0.0  ;;  %v525_v24 = vpop.f32.mrb[3].mxu1 }
 0x218   : > { %v528_v25 = vmax.f32 %v523_v21, 0.0 }
 0x219   : > { %v530_v26 = vpack.c.bf16 %v527_v23, %v527_v23 }
 0x21a   : > { %v531_v27 = vpack.c.bf16 %v528_v25, %v528_v25 }
 0x21b   : > { %v547_v28 = vsel %vm545_vm2, %v530_v26, 0 }
 0x21c   : > { %717 = vmatprep.subr.msk.bf16.mxu1 %vm545_vm2, %v531_v27 }
 0x21d   : > { %553 = vmatpush1.bf16.msra.mxu1 %v547_v28 }
 0x220   : > { %718 = vmatmul.mubr.msk.bf16.vlgmr.msra.gmra.mrb[4].mxu1 %vm374_vm0, %v529_v3 }
 0x2f3   : > { %v586_v34 = vpop.f32.mrb[4].mxu1 }
 0x2f4   : > { %v587_v35 = vadd.f32 %v586_v34, %v541_v33  ;;  %v588_v36 = vpop.f32.mrb[5].mxu1 }
 0x2f5   : > { %v589_v37 = vadd.f32 %v588_v36, %v541_v33  ;;  %v590_v38 = vpop.f32.mrb[6].mxu1 }
 0x2f6   : > { %v719_v39 = vmul.f32 -1.442695, %v587_v35  ;;  %v591_v40 = vpop.f32.mrb[7].mxu1 }
 0x2f7   : > { %v720_v41 = vmul.f32 -1.442695, %v589_v37 }
 0x2f8   : > { %798 = vpow2.f32 %v719_v39 }
 0x2f9   : > { %800 = vpow2.f32 %v720_v41 }
 0x302   : > { %v799_v42 = vpop.eup %798 }
 0x303   : > { %v801_v43 = vpop.eup %800  ;;  %v599_v44 = vadd.f32 1.0, %v799_v42 }
 0x304   : > { %v600_v45 = vadd.f32 1.0, %v801_v43 }
 0x305   : > { %802 = vrcp.f32 %v599_v44 }
 0x306   : > { %804 = vrcp.f32 %v600_v45 }
 0x30f   : > { %v803_v49 = vpop.eup %802 }
 0x310   : > { %v805_v51 = vpop.eup %804 }
 0x311   : > { %v607_v52 = vcombine.low %v803_v49, %v805_v51  ;;  %635 = sbr.rel (!%p954_p5) target bundleno = 819 (0x333), region = 52 }
 0x313   : > { %v614_v53 = vrot.slane %v607_v52, %v613_v50 }
 0x315   : > { %v621_v54 = vrot.slane %v614_v53, %v613_v50 }
 0x317   : > { %627 = vst.msk [vmem:[%s286_s20] sm:$0x3] %vm625_vm3, %v621_v54 }
 0x318   : > { %s1125_s23 = smov (!%p638_p11, %s637_s23), 2 }
 0x319   : > { %s1061_s24 = sshll.u32 %s1125_s23, 4 }
 0x31a   : > { %s642_s25 = ssub.s32 32, %s1061_s24 }
 0x31b   : > { %643 = vsyncadd %s1056_s21, %s642_s25  ;;  %p724_p12 = scmp.ne.s32.totalorder %s1061_s24, 0  ;;  %s1070_s12 = scalar_lea.hbm %s1117_s7, %s965_s14 }
 0x31c   : > { %s648_s10 = sshll.u32 %s286_s20, 4  ;;  %s872_s15 = smov [#allocation3]   ;;  %s649_s10 = int_to_ptr.vmem [resolvable:$true] %s648_s10 }
 0x31d   : > { %s806_s6 = scalar_lea.vmem %s649_s10, %s1061_s24  ;;  %s810_s16 = sshll.u32 %s872_s15, 4  ;;  %s811_s16 = int_to_ptr.vmem [resolvable:$false] %s810_s16 }
 0x31e   : > { %p807_p13 = scmp.ne.s32.totalorder %s649_s10, %s806_s6  ;;  %s812_s17 = scalar_lea.vmem %s811_s16, 64 }
 0x31f   : > { %p813_p2 = scmp.lt.s32.totalorder %s649_s10, %s811_s16  ;;  %p814_p3 = scmp.lt.s32.totalorder %s812_s17, %s806_s6 }
 0x320   : > { %p808_p0 = pnand %p807_p13, %p724_p12 }
 0x321   : > { %p815_p4 = por %p814_p3, %p813_p2 }
 0x322   : > { %p809_p1 = pneg %p808_p0 }
 0x324   : > { %p816_p5 = pnand %p815_p4, %p809_p1 }
 0x326   : > { %819 = shalt.err (!%p816_p5)
}
 0x327   : > { %s820_s14 = scalar_lea.hbm %s1070_s12, %s1061_s24  ;;  %s824_s20 = scalar_lea.hbm %s1117_s7, 48 }
 0x328   : > { %p821_p7 = scmp.ne.s32.totalorder %s1070_s12, %s820_s14  ;;  %p825_p10 = scmp.lt.u32.totalorder %s1070_s12, %s1117_s7 }
 0x329   : > { %p826_p11 = scmp.lt.u32.totalorder %s824_s20, %s820_s14  ;;  %p828_p0 = scmp.lt.u32.totalorder %s820_s14, %s1070_s12 }
 0x32a   : > { %p822_p8 = pnand %p821_p7, %p724_p12 }
 0x32b   : > { %p827_p13 = por %p826_p11, %p825_p10 }
 0x32c   : > { %p823_p9 = pneg %p822_p8 }
 0x32d   : > { %p829_p1 = por %p828_p0, %p827_p13 }
 0x32f   : > { %p830_p2 = pnand %p829_p1, %p823_p9 }
 0x331   : > { %833 = shalt.err (!%p830_p2)
}
 0x332   : > { %651 = dma.vmem_to_hbm [thread:$0]  (%p724_p12), %s649_s10, %s1061_s24, %s1070_s12, %s1056_s21  }
 0x333 PF: > { %p760_p3 = scmp.ge.s32.totalorder %s868_s29, 2  ;;  %s660_s25 = sand.u32 1, %s856_s26  }
 0x334   : > { %s661_s30 = scalar_lea.sflag [#allocation4], %s660_s25 }
 0x335   : > { %p757_p4 = pnand %p760_p3, %p958_p6 }
 0x337   : > { %851 = dma.done.wait (!%p757_p4), %s661_s30, 32  }
 0x338   : > { %853 = vsyncadd (!%p757_p4), %s661_s30, 4294967264  ;;  %p19_p5 = scmp.ge.s32.totalorder %s941_s8, 4   ;;  %s1120_s26 = smov %s860_s27 }
 0x339   : > { %s1121_s27 = smov %s864_s28  ;;  %s1122_s28 = smov %s952_s11 }
 0x33a   : > { %s1123_s29 = smov %s941_s8  ;;  %21 = sbr.rel (!%p19_p5) target bundleno = 6 (0x6), region = 83 }
 0x341   :  { %666 = vsyncpa [#allocation4], 1 }
 0x342   :  { %668 = vsyncpa [#allocation4 + $0x1], 1 }

</bundles_post_ra>
